<compile_context>
chip_gen: v7x
topology: tpu7x:2x2x1
jax: 0.10.0
libtpu: 0.0.40
codegen_flags: <defaults>
</compile_context>

<pallas_src>
import jax
import jax.numpy as jnp
from jax.experimental import pallas as pl
from jax.experimental.pallas import tpu as pltpu

MARGIN = 128.0
EPS = 1e-9


def _make_kernel(D, td):
    d_rem = D % td  # static: mask code only emitted if the last D chunk is partial

    def kernel(e1_ref, e2_ref, lbl_ref, loss_ref, pred_ref, acc_ref):
        k = pl.program_id(1)

        @pl.when(k == 0)
        def _init():
            acc_ref[...] = jnp.zeros_like(acc_ref)

        e1 = e1_ref[...].astype(jnp.float32)
        e2 = e2_ref[...].astype(jnp.float32)
        # sigmoid(x) = 0.5*tanh(0.5*x) + 0.5  =>  s2 - s1 = 0.5*(tanh(e2/2) - tanh(e1/2)).
        # Fold the 0.5 into a single 0.25 on the tiny (tb, 1) reduced result.
        diff = jnp.tanh(0.5 * e2) - jnp.tanh(0.5 * e1)
        if d_rem:
            # Zero out the out-of-range columns of the (padded) last D chunk.
            col = jax.lax.broadcasted_iota(jnp.int32, diff.shape, 1)
            diff = jnp.where(col + k * td < D, diff, 0.0)
        acc_ref[...] += jnp.sum(diff * diff, axis=1, keepdims=True)

        @pl.when(k == pl.num_programs(1) - 1)
        def _finalize():
            dist = 0.25 * acc_ref[...]
            t = lbl_ref[...]
            hinge = jnp.maximum(MARGIN - jnp.sqrt(dist + EPS), 0.0)
            loss_ref[...] = 0.5 * (t * dist + (1.0 - t) * hinge * hinge)
            pred_ref[...] = 1.0 - dist

    return kernel


def _vmem_limit_bytes():
    """Generation-aware VMEM limit: 3/4 of physical capacity, capped at 96 MiB."""
    try:
        cap = int(pltpu.get_tpu_info().vmem_capacity_bytes)
    except Exception:
        cap = 64 * 1024 * 1024  # conservative (v7x per-TensorCore)
    return int(min((cap * 3) // 4, 96 * 1024 * 1024))


def _choose_blocks(B, D, itemsize, vmem_limit):
    """Pick (tb, td) so the full working set fits comfortably under vmem_limit.

    Per-element cost per grid step:
      2 inputs x 2 pipeline buffers x itemsize   (BlockSpec double buffering)
    + ~3 tile-sized f32 temporaries              (f32 upcasts / tanh results / diff)
    """
    bytes_per_elem = 4 * itemsize + 3 * 4
    budget = max(vmem_limit // 2, 2 * 1024 * 1024)  # leave half the limit as headroom
    max_elems = max(budget // bytes_per_elem, 8 * 128)

    if B * D <= max_elems:
        return B, D  # single block == full dims (always legal)

    if B > 128 and 128 * D <= max_elems:
        # Common case: full feature dim per block, tile batch rows only.
        tb = (max_elems // D // 128) * 128
        return min(tb, B), D

    # Very wide feature dim: keep a modest row tile and split D (reduction axis).
    tb = B if B <= 256 else 256
    td = (max_elems // tb // 128) * 128
    td = max(128, min(td, D))
    return tb, td


def contrastive_loss(enc1, enc2, label, block_override=None):
    """enc1, enc2: (B, D) float (f32 or bf16); label: (B,) {0,1}.

    Returns (scalar mean loss, 1 - distances of shape (B,)), matching
    Loss.forward in the PyTorch spec.
    """
    B, D = enc1.shape
    itemsize = jnp.dtype(enc1.dtype).itemsize
    vmem_limit = _vmem_limit_bytes()
    if block_override is not None:
        tb, td = block_override
        tb, td = min(tb, B), min(td, D)
    else:
        tb, td = _choose_blocks(B, D, itemsize, vmem_limit)

    lbl = label.astype(jnp.float32).reshape(B, 1)
    grid = (pl.cdiv(B, tb), pl.cdiv(D, td))

    cost = pl.CostEstimate(
        flops=int(7 * B * D),
        transcendentals=int(2 * B * D),
        bytes_accessed=int(2 * B * D * itemsize + 4 * B * 4),
    )

    losses, pred = pl.pallas_call(
        _make_kernel(D, td),
        out_shape=(
            jax.ShapeDtypeStruct((B, 1), jnp.float32),  # per-row losses
            jax.ShapeDtypeStruct((B, 1), jnp.float32),  # per-row 1 - dist
        ),
        grid=grid,
        in_specs=[
            pl.BlockSpec((tb, td), lambda i, k: (i, k)),
            pl.BlockSpec((tb, td), lambda i, k: (i, k)),
            pl.BlockSpec((tb, 1), lambda i, k: (i, 0)),
        ],
        out_specs=(
            pl.BlockSpec((tb, 1), lambda i, k: (i, 0)),
            pl.BlockSpec((tb, 1), lambda i, k: (i, 0)),
        ),
        scratch_shapes=[pltpu.VMEM((tb, 1), jnp.float32)],
        compiler_params=pltpu.CompilerParams(
            # TODO(synk): confirm in xprof that "parallel" shards the B axis over
            # both v7x TensorCores; switch to pltpu.CORE_PARALLEL if it does not.
            dimension_semantics=("parallel", "arbitrary"),
            vmem_limit_bytes=vmem_limit,
        ),
        cost_estimate=cost,
    )(enc1, enc2, lbl)

    # Mean over the B real rows (padded rows of a partial last B tile are never
    # written back, so they cannot poison the sum).
    loss = jnp.sum(losses) / B
    return loss, pred.reshape(-1)


def _reference(enc1, enc2, label):
    s1 = jax.nn.sigmoid(enc1.astype(jnp.float32))
    s2 = jax.nn.sigmoid(enc2.astype(jnp.float32))
    dist = jnp.sum((s2 - s1) ** 2, axis=1)
    t = label.astype(jnp.float32)
    hinge = jnp.maximum(MARGIN - jnp.sqrt(dist + EPS), 0.0)
    losses = 0.5 * (t * dist + (1.0 - t) * hinge ** 2)
    return losses.mean(), 1.0 - dist.reshape(-1)


if __name__ == "__main__":
    key = jax.random.PRNGKey(0)
    k1, k2, k3, k4, k5, k6 = jax.random.split(key, 6)

    # Small shape (single-block path).
    B, D = 8, 32
    enc1 = jax.random.normal(k1, (B, D), dtype=jnp.float32)
    enc2 = jax.random.normal(k2, (B, D), dtype=jnp.float32)
    label = jax.random.bernoulli(k3, 0.5, (B,)).astype(jnp.int32)

    loss, pred = jax.jit(contrastive_loss)(enc1, enc2, label)
    loss = jax.block_until_ready(loss)
    pred = jax.block_until_ready(pred)

    ref_loss, ref_pred = _reference(enc1, enc2, label)
    assert jnp.allclose(loss, ref_loss, rtol=1e-5, atol=1e-4), (loss, ref_loss)
    assert jnp.allclose(pred, ref_pred, rtol=1e-5, atol=1e-3)

    # Forced multi-tile path: exercises the B grid (partial last tile), the inner
    # "arbitrary" D reduction axis with its (tb, 1) accumulator, and the partial
    # last-D-chunk mask (320 % 128 != 0).
    B2, D2 = 200, 320
    e1b = jax.random.normal(k4, (B2, D2), dtype=jnp.float32)
    e2b = jax.random.normal(k5, (B2, D2), dtype=jnp.float32)
    lblb = jax.random.bernoulli(k6, 0.5, (B2,)).astype(jnp.int32)

    tiled = jax.jit(lambda a, b, c: contrastive_loss(a, b, c, block_override=(128, 128)))
    loss2, pred2 = tiled(e1b, e2b, lblb)
    loss2 = jax.block_until_ready(loss2)
    pred2 = jax.block_until_ready(pred2)

    ref_loss2, ref_pred2 = _reference(e1b, e2b, lblb)
    assert jnp.allclose(loss2, ref_loss2, rtol=1e-5, atol=1e-3), (loss2, ref_loss2)
    assert jnp.allclose(pred2, ref_pred2, rtol=1e-5, atol=1e-3)

    print("KERNEL_OK")
</pallas_src>

<mosaic_0001>
module attributes {stable_mosaic.version = 11 : i64} {
  func.func @kernel(%arg0: i32, %arg1: i32, %arg2: memref<8x32xf32, #tpu.memory_space<vmem>>, %arg3: memref<8x32xf32, #tpu.memory_space<vmem>>, %arg4: memref<8x1xf32, #tpu.memory_space<vmem>>, %arg5: memref<8x1xf32, #tpu.memory_space<vmem>>, %arg6: memref<8x1xf32, #tpu.memory_space<vmem>>, %arg7: memref<8x1xf32, #tpu.memory_space<vmem>>) attributes {dimension_semantics = [#tpu.dimension_semantics<parallel>, #tpu.dimension_semantics<arbitrary>], iteration_bounds = array<i64: 1, 1>, scalar_prefetch = 0 : i64, scratch_operands = 1 : i64, tpu.core_type = #tpu.core_type<tc>, window_params = [{transform_indices = @transform_0, window_bounds = array<i64: 8, 32>}, {transform_indices = @transform_1, window_bounds = array<i64: 8, 32>}, {transform_indices = @transform_2, window_bounds = array<i64: 8, 1>}, {transform_indices = @transform_3, window_bounds = array<i64: 8, 1>}, {transform_indices = @transform_4, window_bounds = array<i64: 8, 1>}]} {
    %c0_i32 = arith.constant 0 : i32
    %0 = arith.cmpi eq, %arg1, %c0_i32 : i32
    %1 = arith.extui %0 : i1 to i32
    %c0_i32_0 = arith.constant 0 : i32
    %2 = arith.cmpi ne, %1, %c0_i32_0 : i32
    scf.if %2 {
      %cst_12 = arith.constant 0.000000e+00 : f32
      %21 = vector.broadcast %cst_12 : f32 to vector<8x1xf32>
      %c0_13 = arith.constant 0 : index
      %c0_14 = arith.constant 0 : index
      %22 = vector.load %arg7[%c0_13, %c0_14] : memref<8x1xf32, #tpu.memory_space<vmem>>, vector<8x1xf32>
      tpu.vector_store %arg7[%c0_13, %c0_14], %21 {strides = array<i32>} : memref<8x1xf32, #tpu.memory_space<vmem>>, vector<8x1xf32>,
    } else {
    }
    %c0 = arith.constant 0 : index
    %c0_1 = arith.constant 0 : index
    %3 = vector.load %arg2[%c0, %c0_1] : memref<8x32xf32, #tpu.memory_space<vmem>>, vector<8x32xf32>
    %c0_2 = arith.constant 0 : index
    %c0_3 = arith.constant 0 : index
    %4 = vector.load %arg3[%c0_2, %c0_3] : memref<8x32xf32, #tpu.memory_space<vmem>>, vector<8x32xf32>
    %cst = arith.constant 5.000000e-01 : f32
    %5 = vector.broadcast %cst : f32 to vector<8x32xf32>
    %6 = arith.mulf %5, %4 : vector<8x32xf32>
    %7 = math.tanh %6 : vector<8x32xf32>
    %cst_4 = arith.constant 5.000000e-01 : f32
    %8 = vector.broadcast %cst_4 : f32 to vector<8x32xf32>
    %9 = arith.mulf %8, %3 : vector<8x32xf32>
    %10 = math.tanh %9 : vector<8x32xf32>
    %11 = arith.subf %7, %10 : vector<8x32xf32>
    %c0_5 = arith.constant 0 : index
    %c0_6 = arith.constant 0 : index
    %12 = vector.load %arg7[%c0_5, %c0_6] : memref<8x1xf32, #tpu.memory_space<vmem>>, vector<8x1xf32>
    %13 = arith.mulf %11, %11 : vector<8x32xf32>
    %cst_7 = arith.constant dense<0.000000e+00> : vector<8xf32>
    %14 = vector.multi_reduction <add>, %13, %cst_7 [1] : vector<8x32xf32> to vector<8xf32>
    %15 = vector.shape_cast %14 : vector<8xf32> to vector<8x1xf32>
    %16 = arith.addf %12, %15 : vector<8x1xf32>
    %c0_8 = arith.constant 0 : index
    %c0_9 = arith.constant 0 : index
    %17 = vector.load %arg7[%c0_8, %c0_9] : memref<8x1xf32, #tpu.memory_space<vmem>>, vector<8x1xf32>
    tpu.vector_store %arg7[%c0_8, %c0_9], %16 {strides = array<i32>} : memref<8x1xf32, #tpu.memory_space<vmem>>, vector<8x1xf32>,
    %c0_i32_10 = arith.constant 0 : i32
    %18 = arith.cmpi eq, %arg1, %c0_i32_10 : i32
    %19 = arith.extui %18 : i1 to i32
    %c0_i32_11 = arith.constant 0 : i32
    %20 = arith.cmpi ne, %19, %c0_i32_11 : i32
    scf.if %20 {
      %c0_12 = arith.constant 0 : index
      %c0_13 = arith.constant 0 : index
      %21 = vector.load %arg7[%c0_12, %c0_13] : memref<8x1xf32, #tpu.memory_space<vmem>>, vector<8x1xf32>
      %cst_14 = arith.constant 2.500000e-01 : f32
      %22 = vector.broadcast %cst_14 : f32 to vector<8x1xf32>
      %23 = arith.mulf %22, %21 : vector<8x1xf32>
      %c0_15 = arith.constant 0 : index
      %c0_16 = arith.constant 0 : index
      %24 = vector.load %arg4[%c0_15, %c0_16] : memref<8x1xf32, #tpu.memory_space<vmem>>, vector<8x1xf32>
      %cst_17 = arith.constant 9.99999971E-10 : f32
      %25 = vector.broadcast %cst_17 : f32 to vector<8x1xf32>
      %26 = arith.addf %23, %25 : vector<8x1xf32>
      %27 = math.sqrt %26 : vector<8x1xf32>
      %cst_18 = arith.constant 1.280000e+02 : f32
      %28 = vector.broadcast %cst_18 : f32 to vector<8x1xf32>
      %29 = arith.subf %28, %27 : vector<8x1xf32>
      %cst_19 = arith.constant 0.000000e+00 : f32
      %30 = vector.broadcast %cst_19 : f32 to vector<8x1xf32>
      %31 = arith.maximumf %29, %30 : vector<8x1xf32>
      %32 = arith.mulf %24, %23 : vector<8x1xf32>
      %cst_20 = arith.constant 1.000000e+00 : f32
      %33 = vector.broadcast %cst_20 : f32 to vector<8x1xf32>
      %34 = arith.subf %33, %24 : vector<8x1xf32>
      %35 = arith.mulf %34, %31 : vector<8x1xf32>
      %36 = arith.mulf %35, %31 : vector<8x1xf32>
      %37 = arith.addf %32, %36 : vector<8x1xf32>
      %cst_21 = arith.constant 5.000000e-01 : f32
      %38 = vector.broadcast %cst_21 : f32 to vector<8x1xf32>
      %39 = arith.mulf %38, %37 : vector<8x1xf32>
      %c0_22 = arith.constant 0 : index
      %c0_23 = arith.constant 0 : index
      %40 = vector.load %arg5[%c0_22, %c0_23] : memref<8x1xf32, #tpu.memory_space<vmem>>, vector<8x1xf32>
      tpu.vector_store %arg5[%c0_22, %c0_23], %39 {strides = array<i32>} : memref<8x1xf32, #tpu.memory_space<vmem>>, vector<8x1xf32>,
      %cst_24 = arith.constant 1.000000e+00 : f32
      %41 = vector.broadcast %cst_24 : f32 to vector<8x1xf32>
      %42 = arith.subf %41, %23 : vector<8x1xf32>
      %c0_25 = arith.constant 0 : index
      %c0_26 = arith.constant 0 : index
      %43 = vector.load %arg6[%c0_25, %c0_26] : memref<8x1xf32, #tpu.memory_space<vmem>>, vector<8x1xf32>
      tpu.vector_store %arg6[%c0_25, %c0_26], %42 {strides = array<i32>} : memref<8x1xf32, #tpu.memory_space<vmem>>, vector<8x1xf32>,
    } else {
    }
    return
  }
  func.func @transform_0(%arg0: i32, %arg1: i32) -> (i32, i32) {
    %c0_i32 = arith.constant 0 : i32
    return %arg0, %arg1 : i32, i32
  }
  func.func @transform_1(%arg0: i32, %arg1: i32) -> (i32, i32) {
    %c0_i32 = arith.constant 0 : i32
    return %arg0, %arg1 : i32, i32
  }
  func.func @transform_2(%arg0: i32, %arg1: i32) -> (i32, i32) {
    %c0_i32 = arith.constant 0 : i32
    %c0_i32_0 = arith.constant 0 : i32
    return %arg0, %c0_i32 : i32, i32
  }
  func.func @transform_3(%arg0: i32, %arg1: i32) -> (i32, i32) {
    %c0_i32 = arith.constant 0 : i32
    %c0_i32_0 = arith.constant 0 : i32
    return %arg0, %c0_i32 : i32, i32
  }
  func.func @transform_4(%arg0: i32, %arg1: i32) -> (i32, i32) {
    %c0_i32 = arith.constant 0 : i32
    %c0_i32_0 = arith.constant 0 : i32
    return %arg0, %c0_i32 : i32, i32
  }
}

</mosaic_0001>

<bundles_post_ra>
// kernel: contrastive_loss.1
= control target key start
LH: loop header
LB: loop body
LE: loop exit
PB: predicated region body
PF: predicated region fallthrough
CT: control target
= control target key end

     0   :  { %vm20_vm0 = vcmask 7168   ;;  %v78_v2 = vmov 0.0   ;;  %vm31_vm1 = vcmask 261120   ;;  %s123_s0 = inlined_call_operand.vmem [shape: f32[8,32], index: 0, kind: input, shape index: {}]   ;;  %s124_s1 = inlined_call_operand.vmem [shape: f32[8,32], index: 1, kind: input, shape index: {}]   ;;  %s125_s4 = inlined_call_operand.vmem [shape: f32[8,1], index: 4, kind: output, shape index: {1}]   ;;  %s126_s2 = inlined_call_operand.vmem [shape: f32[8,1], index: 2, kind: input, shape index: {}]   ;;  %s127_s3 = inlined_call_operand.vmem [shape: f32[8,1], index: 3, kind: output, shape index: {0}]  }
   0x1   :  { %v22_v0 = vld [vmem:[%s123_s0] sm:$0xff]  ;;  %21 = vst.msk [vmem:[#allocation2] sm:$0xff] %vm20_vm0, %v78_v2 }
   0x2   :  { %v23_v1 = vld [vmem:[%s124_s1] sm:$0xff]  ;;  %v26_v4 = vmul.f32 0.5, %v22_v0 }
   0x3   :  { %v24_v3 = vmul.f32 0.5, %v23_v1  ;;  %v43_v21 = vld [vmem:[%s126_s2] sm:$0xff] }
   0x4   :  { %v55_v24 = vsub.f32 1.0, %v43_v21 }
   0x5   :  { %72 = vtanh.f32 %v24_v3 }
   0x6   :  { %74 = vtanh.f32 %v26_v4 }
   0x8   :  { %v29_v10 = vld [vmem:[#allocation2] sm:$0xff] }
   0xf   :  { %v73_v5 = vpop.eup %72 }
  0x10   :  { %v75_v6 = vpop.eup %74 }
  0x11   :  { %v28_v7 = vsub.f32 %v73_v5, %v75_v6 }
  0x13   :  { %v30_v8 = vmul.f32 %v28_v7, %v28_v7 }
  0x15   :  { %v32_v9 = vsel %vm31_vm1, %v30_v8, 0.0 }
  0x16   :  { %33 = vadd.xlane.f32.xlu0 %v32_v9 }
  0xa3   :  { %v34_v11 = vpop.xlane.xlu0 %33 }
  0xa4   :  { %v35_v12 = vadd.f32 %v34_v11, %v29_v10 }
  0xa6   :  { %37 = vst.msk [vmem:[#allocation2] sm:$0xff] %vm20_vm0, %v35_v12 }
  0xad   :  { %v41_v13 = vld [vmem:[#allocation2] sm:$0xff] }
  0xae   :  { %v42_v14 = vmul.f32 0.25, %v41_v13 }
  0xb0   :  { %v44_v15 = vadd.f32 1e-09, %v42_v14  ;;  %v61_v16 = vsub.f32 1.0, %v42_v14  ;;  %v54_v27 = vmul.f32 %v43_v21, %v42_v14 }
  0xb2   :  { %76 = vrsqrt.f32 %v44_v15  ;;  %62 = vst.msk [vmem:[%s125_s4] sm:$0xff] %vm20_vm0, %v61_v16  ;;  %vm47_vm2 = vcmp.eq.f32.partialorder %v44_v15, inf  ;;  %v50_v19 = vand.u32 2147483648, %v44_v15  ;;  %vm49_vm3 = vcmp.eq.f32.partialorder %v44_v15, 0.0 }
  0xbc   :  { %v77_v17 = vpop.eup %76 }
  0xbd   :  { %v46_v18 = vmul.f32 %v77_v17, %v44_v15 }
  0xbf   :  { %v48_v20 = vsel %vm47_vm2, %v44_v15, %v46_v18 }
  0xc0   :  { %v51_v22 = vsel %vm49_vm3, %v50_v19, %v48_v20 }
  0xc1   :  { %v52_v23 = vsub.f32 128.0, %v51_v22 }
  0xc3   :  { %v53_v25 = vmax.f32 %v52_v23, 0.0 }
  0xc5   :  { %v56_v26 = vmul.f32 %v55_v24, %v53_v25 }
  0xc7   :  { %v57_v28 = vmul.f32 %v56_v26, %v53_v25 }
  0xc9   :  { %v58_v29 = vadd.f32 %v57_v28, %v54_v27 }
  0xcb   :  { %v59_v30 = vmul.f32 0.5, %v58_v29 }
  0xcd   :  { %60 = vst.msk [vmem:[%s127_s3] sm:$0xff] %vm20_vm0, %v59_v30 }

</bundles_post_ra>
